<compile_context>
chip_gen: v7x
topology: tpu7x:2x2x1
jax: 0.10.0
libtpu: 0.0.40
codegen_flags: <defaults>
</compile_context>

<pallas_src>
import functools

import jax
import jax.numpy as jnp
from jax.experimental import pallas as pl
from jax.experimental.pallas import tpu as pltpu


def _attn_general_kernel(hidden_ref, enc_ref, w_ref, out_ref, u_ref, e_ref,
                         *, block_s: int, num_s: int):
    # hidden_ref: (tB, H)              enc_ref: (tS, tB, H)  native (S,B,H) tile
    # w_ref:      (H, H)  torch (out, in) layout
    # out_ref:    (tB, S) f32, resident across the S grid axis (lane-dense on S)
    # u_ref:      (tB, H) f32 scratch   e_ref: (num_s, tB, tS) f32 scratch
    s = pl.program_id(1)

    # ---- hoisted once per batch tile: u = h @ W on the MXU ----
    # (bias omitted: h.b is constant per batch row and cancels under softmax.)
    @pl.when(s == 0)
    def _():
        u_ref[...] = jnp.dot(hidden_ref[...], w_ref[...],
                             preferred_element_type=jnp.float32)

    # ---- per-S-tile energies in native layout: e[s,b] = sum_h enc[s,b,h]*u[b,h]
    # VPU multiply + lane reduce with f32 accumulation; only the small 2-D
    # (tS, tB) result is transposed to the (tB, S) output orientation.
    e = jnp.sum(enc_ref[...] * u_ref[...][None, :, :], axis=-1)      # (tS, tB) f32
    e_ref[s] = e.T                                                   # (tB, tS)

    # ---- last S tile: softmax over the full sequence, exact normalization ----
    @pl.when(s == pl.num_programs(1) - 1)
    def _():
        e_all = e_ref[...]                               # (num_s, tB, tS)
        m = jnp.max(e_all, axis=2, keepdims=True)
        m = jnp.max(m, axis=0, keepdims=True)            # (1, tB, 1)
        p = jnp.exp(e_all - m)
        denom = jnp.sum(p, axis=2, keepdims=True)
        denom = jnp.sum(denom, axis=0, keepdims=True)    # (1, tB, 1)
        p = p * (1.0 / denom)                            # exact divide, once per batch tile
        for k in range(num_s):                           # static unroll, static lane slices
            out_ref[:, k * block_s:(k + 1) * block_s] = p[k].astype(out_ref.dtype)


def _largest_divisor_leq(n, cap, valid=None):
    best = None
    d = 1
    while d * d <= n:
        if n % d == 0:
            for c in (d, n // d):
                if c <= cap and (valid is None or valid(c)):
                    if best is None or c > best:
                        best = c
        d += 1
    return best


def attn_general(hidden, encoder_outputs, w, bias=None, *,
                 block_b=None, block_s=None,
                 enc_vmem_budget_bytes=8 * 1024 * 1024):
    """Pallas TPU forward of Attn(method='general').

    hidden: (B, H); encoder_outputs: (S, B, H) (PyTorch layout, consumed as-is);
    w: (H, H) torch nn.Linear weight (out, in); bias: (H,) accepted for API
    parity but unused -- h.b is a per-row constant and cancels exactly under
    the softmax over S.  Returns attention weights of shape (B, 1, S), float32.
    """
    S, B, H = encoder_outputs.shape
    assert hidden.shape == (B, H)
    del bias  # cancels under softmax over S (shift invariance)

    enc_bytes = jnp.dtype(encoder_outputs.dtype).itemsize
    par_bytes = jnp.dtype(w.dtype).itemsize

    # Batch tile: multiple of 8 (or whole batch) dividing B; prefer >=2 batch
    # tiles so the "parallel" grid axis can feed both TensorCores on v7x.
    if block_b is None:
        block_b = _largest_divisor_leq(
            B, max(8, B // 2), valid=lambda d: d == B or d % 8 == 0) or B
    assert B % block_b == 0 and (block_b == B or block_b % 8 == 0)

    # Seq tile: biggest divisor of S whose double-buffered enc tile fits the
    # streaming budget (dtype / B / H aware instead of a flat 512).
    if block_s is None:
        cap = max(1, enc_vmem_budget_bytes // (2 * block_b * H * enc_bytes))
        block_s = _largest_divisor_leq(S, min(cap, S)) or S
    assert S % block_s == 0
    num_s = S // block_s
    num_b = B // block_b

    # Scoped-VMEM estimate: enc double buffer + resident operands + out block
    # + f32 scratch (projection u, energies).  Cap at 64 MiB (v7x physical).
    est = (2 * block_s * block_b * H * enc_bytes
           + 2 * block_b * H * par_bytes
           + 2 * H * H * par_bytes
           + 2 * block_b * S * 4
           + block_b * H * 4
           + block_b * S * 4)
    vmem_limit = int(min(64 * 2**20, max(32 * 2**20, 2 * est)))

    kernel = functools.partial(_attn_general_kernel, block_s=block_s, num_s=num_s)

    # TODO(synk): pipeline_mode=pl.Buffered(1) on hidden/W would drop their
    #             second pipeline buffer (saves ~H*H*dtype bytes on v7x).
    out2d = pl.pallas_call(
        kernel,
        out_shape=jax.ShapeDtypeStruct((B, S), jnp.float32),
        grid_spec=pltpu.PrefetchScalarGridSpec(
            num_scalar_prefetch=0,
            grid=(num_b, num_s),  # (batch tiles [parallel], seq tiles [reduction])
            in_specs=[
                pl.BlockSpec((block_b, H), lambda b, s: (b, 0)),              # hidden (resident over s)
                pl.BlockSpec((block_s, block_b, H), lambda b, s: (s, b, 0)),  # enc streamed over S
                pl.BlockSpec((H, H), lambda b, s: (0, 0)),                    # W (resident)
            ],
            out_specs=pl.BlockSpec((block_b, S), lambda b, s: (b, 0)),        # resident across S
            scratch_shapes=[
                pltpu.VMEM((block_b, H), jnp.float32),                # u = h @ W
                pltpu.VMEM((num_s, block_b, block_s), jnp.float32),   # energies
            ],
        ),
        compiler_params=pltpu.CompilerParams(
            dimension_semantics=("parallel", "arbitrary"),
            vmem_limit_bytes=vmem_limit),
    )(hidden, encoder_outputs, w)

    return out2d[:, None, :]  # (B, 1, S); free metadata reshape


if __name__ == "__main__":
    S, B, H = 16, 16, 32
    key = jax.random.PRNGKey(0)
    k1, k2, k3, k4 = jax.random.split(key, 4)

    hidden = jax.random.normal(k1, (B, H), jnp.float32)
    encoder_outputs = jax.random.normal(k2, (S, B, H), jnp.float32)

    # nn.Linear(H, H) parameters, deterministic init (uniform +/- 1/sqrt(H))
    bound = 1.0 / (H ** 0.5)
    w = jax.random.uniform(k3, (H, H), jnp.float32, -bound, bound)   # (out, in)
    bias = jax.random.uniform(k4, (H,), jnp.float32, -bound, bound)

    # block_b=8, block_s=8 -> grid (2, 2): exercises both batch tiling and the
    # multi-tile S streaming / resident-output path.
    out = jax.block_until_ready(
        attn_general(hidden, encoder_outputs, w, bias, block_b=8, block_s=8))

    # pure-JAX reference of the PyTorch forward (method='general')
    proj = jnp.einsum("sbh,oh->sbo", encoder_outputs, w) + bias       # nn.Linear
    energies = jnp.einsum("sbh,bh->sb", proj, hidden)                 # (S, B)
    ref = jax.nn.softmax(energies, axis=0).T[:, None, :]              # (B, 1, S)

    assert out.shape == (B, 1, S), out.shape
    assert jnp.allclose(out, ref, atol=1e-4, rtol=1e-4), "mismatch vs reference"
    print("KERNEL_OK")
</pallas_src>

<mosaic_0001>
module attributes {stable_mosaic.version = 11 : i64} {
  func.func @_attn_general_kernel(%arg0: i32, %arg1: i32, %arg2: memref<8x32xf32, #tpu.memory_space<vmem>>, %arg3: memref<8x8x32xf32, #tpu.memory_space<vmem>>, %arg4: memref<32x32xf32, #tpu.memory_space<vmem>>, %arg5: memref<8x16xf32, #tpu.memory_space<vmem>>, %arg6: memref<8x32xf32, #tpu.memory_space<vmem>>, %arg7: memref<2x8x8xf32, #tpu.memory_space<vmem>>) attributes {dimension_semantics = [#tpu.dimension_semantics<parallel>, #tpu.dimension_semantics<arbitrary>], iteration_bounds = array<i64: 2, 2>, scalar_prefetch = 0 : i64, scratch_operands = 2 : i64, tpu.core_type = #tpu.core_type<tc>, window_params = [{transform_indices = @transform_0, window_bounds = array<i64: 8, 32>}, {transform_indices = @transform_1, window_bounds = array<i64: 8, 8, 32>}, {pipeline_mode = #tpu.pipeline_mode<synchronous>, transform_indices = @transform_2, window_bounds = array<i64: 32, 32>}, {transform_indices = @transform_3, window_bounds = array<i64: 8, 16>}]} {
    %c0_i32 = arith.constant 0 : i32
    %0 = arith.cmpi eq, %arg1, %c0_i32 : i32
    %1 = arith.extui %0 : i1 to i32
    %c0_i32_0 = arith.constant 0 : i32
    %2 = arith.cmpi ne, %1, %c0_i32_0 : i32
    scf.if %2 {
      %c0_8 = arith.constant 0 : index
      %c0_9 = arith.constant 0 : index
      %17 = vector.load %arg2[%c0_8, %c0_9] : memref<8x32xf32, #tpu.memory_space<vmem>>, vector<8x32xf32>
      %c0_10 = arith.constant 0 : index
      %c0_11 = arith.constant 0 : index
      %18 = vector.load %arg4[%c0_10, %c0_11] : memref<32x32xf32, #tpu.memory_space<vmem>>, vector<32x32xf32>
      %cst_12 = arith.constant dense<0.000000e+00> : vector<8x32xf32>
      %19 = tpu.matmul %17, %18, %cst_12 {dimension_numbers = #tpu.dot_dimension_numbers<[1], [0], [0], [1], [0, 0, 1, 1], [], []>} : vector<8x32xf32>, vector<32x32xf32>, vector<8x32xf32> -> vector<8x32xf32>
      %c0_13 = arith.constant 0 : index
      %c0_14 = arith.constant 0 : index
      %20 = vector.load %arg6[%c0_13, %c0_14] : memref<8x32xf32, #tpu.memory_space<vmem>>, vector<8x32xf32>
      tpu.vector_store %arg6[%c0_13, %c0_14], %19 {strides = array<i32>} : memref<8x32xf32, #tpu.memory_space<vmem>>, vector<8x32xf32>,
    } else {
    }
    %c0 = arith.constant 0 : index
    %c0_1 = arith.constant 0 : index
    %c0_2 = arith.constant 0 : index
    %3 = vector.load %arg3[%c0, %c0_1, %c0_2] : memref<8x8x32xf32, #tpu.memory_space<vmem>>, vector<8x8x32xf32>
    %c0_3 = arith.constant 0 : index
    %c0_4 = arith.constant 0 : index
    %4 = vector.load %arg6[%c0_3, %c0_4] : memref<8x32xf32, #tpu.memory_space<vmem>>, vector<8x32xf32>
    %5 = vector.shape_cast %4 : vector<8x32xf32> to vector<1x8x32xf32>
    %6 = vector.broadcast %5 : vector<1x8x32xf32> to vector<8x8x32xf32>
    %7 = arith.mulf %3, %6 : vector<8x8x32xf32>
    %cst = arith.constant dense<0.000000e+00> : vector<8x8xf32>
    %8 = vector.multi_reduction <add>, %7, %cst [2] : vector<8x8x32xf32> to vector<8x8xf32>
    %9 = tpu.transpose %8, [1, 0] : vector<8x8xf32> -> vector<8x8xf32>
    %10 = arith.index_cast %arg1 : i32 to index
    %c0_5 = arith.constant 0 : index
    %c0_6 = arith.constant 0 : index
    %11 = vector.load %arg7[%10, %c0_5, %c0_6] : memref<2x8x8xf32, #tpu.memory_space<vmem>>, vector<1x8x8xf32>
    %12 = vector.shape_cast %11 : vector<1x8x8xf32> to vector<8x8xf32>
    %13 = vector.shape_cast %9 : vector<8x8xf32> to vector<1x8x8xf32>
    tpu.vector_store %arg7[%10, %c0_5, %c0_6], %13 {strides = array<i32>} : memref<2x8x8xf32, #tpu.memory_space<vmem>>, vector<1x8x8xf32>,
    %c1_i32 = arith.constant 1 : i32
    %14 = arith.cmpi eq, %arg1, %c1_i32 : i32
    %15 = arith.extui %14 : i1 to i32
    %c0_i32_7 = arith.constant 0 : i32
    %16 = arith.cmpi ne, %15, %c0_i32_7 : i32
    scf.if %16 {
      %c0_8 = arith.constant 0 : index
      %c0_9 = arith.constant 0 : index
      %c0_10 = arith.constant 0 : index
      %17 = vector.load %arg7[%c0_8, %c0_9, %c0_10] : memref<2x8x8xf32, #tpu.memory_space<vmem>>, vector<2x8x8xf32>
      %cst_11 = arith.constant dense<0xFF800000> : vector<2x8xf32>
      %18 = vector.multi_reduction <maximumf>, %17, %cst_11 [2] : vector<2x8x8xf32> to vector<2x8xf32>
      %19 = vector.shape_cast %18 : vector<2x8xf32> to vector<2x8x1xf32>
      %cst_12 = arith.constant dense<0xFF800000> : vector<8x1xf32>
      %20 = vector.multi_reduction <maximumf>, %19, %cst_12 [0] : vector<2x8x1xf32> to vector<8x1xf32>
      %21 = vector.shape_cast %20 : vector<8x1xf32> to vector<1x8x1xf32>
      %22 = vector.broadcast %21 : vector<1x8x1xf32> to vector<2x8x8xf32>
      %23 = arith.subf %17, %22 : vector<2x8x8xf32>
      %24 = math.exp %23 : vector<2x8x8xf32>
      %cst_13 = arith.constant dense<0.000000e+00> : vector<2x8xf32>
      %25 = vector.multi_reduction <add>, %24, %cst_13 [2] : vector<2x8x8xf32> to vector<2x8xf32>
      %26 = vector.shape_cast %25 : vector<2x8xf32> to vector<2x8x1xf32>
      %cst_14 = arith.constant dense<0.000000e+00> : vector<8x1xf32>
      %27 = vector.multi_reduction <add>, %26, %cst_14 [0] : vector<2x8x1xf32> to vector<8x1xf32>
      %28 = vector.shape_cast %27 : vector<8x1xf32> to vector<1x8x1xf32>
      %cst_15 = arith.constant 1.000000e+00 : f32
      %29 = vector.broadcast %cst_15 : f32 to vector<1x8x1xf32>
      %30 = arith.divf %29, %28 : vector<1x8x1xf32>
      %31 = vector.broadcast %30 : vector<1x8x1xf32> to vector<2x8x8xf32>
      %32 = arith.mulf %24, %31 : vector<2x8x8xf32>
      %33 = vector.extract_strided_slice %32 {offsets = [0, 0, 0], sizes = [1, 8, 8], strides = [1, 1, 1]} : vector<2x8x8xf32> to vector<1x8x8xf32>
      %34 = vector.shape_cast %33 : vector<1x8x8xf32> to vector<8x8xf32>
      %c0_16 = arith.constant 0 : index
      %c0_17 = arith.constant 0 : index
      %35 = vector.load %arg5[%c0_16, %c0_17] : memref<8x16xf32, #tpu.memory_space<vmem>>, vector<8x8xf32>
      tpu.vector_store %arg5[%c0_16, %c0_17], %34 {strides = array<i32>} : memref<8x16xf32, #tpu.memory_space<vmem>>, vector<8x8xf32>,
      %36 = vector.extract_strided_slice %32 {offsets = [1, 0, 0], sizes = [1, 8, 8], strides = [1, 1, 1]} : vector<2x8x8xf32> to vector<1x8x8xf32>
      %37 = vector.shape_cast %36 : vector<1x8x8xf32> to vector<8x8xf32>
      %c0_18 = arith.constant 0 : index
      %c8 = arith.constant 8 : index
      %38 = vector.load %arg5[%c0_18, %c8] : memref<8x16xf32, #tpu.memory_space<vmem>>, vector<8x8xf32>
      tpu.vector_store %arg5[%c0_18, %c8], %37 {strides = array<i32>} : memref<8x16xf32, #tpu.memory_space<vmem>>, vector<8x8xf32>,
    } else {
    }
    return
  }
  func.func @transform_0(%arg0: i32, %arg1: i32) -> (i32, i32) {
    %c0_i32 = arith.constant 0 : i32
    %c0_i32_0 = arith.constant 0 : i32
    return %arg0, %c0_i32 : i32, i32
  }
  func.func @transform_1(%arg0: i32, %arg1: i32) -> (i32, i32, i32) {
    %c0_i32 = arith.constant 0 : i32
    %c0_i32_0 = arith.constant 0 : i32
    return %arg1, %arg0, %c0_i32 : i32, i32, i32
  }
  func.func @transform_2(%arg0: i32, %arg1: i32) -> (i32, i32) {
    %c0_i32 = arith.constant 0 : i32
    %c0_i32_0 = arith.constant 0 : i32
    %c0_i32_1 = arith.constant 0 : i32
    return %c0_i32, %c0_i32_0 : i32, i32
  }
  func.func @transform_3(%arg0: i32, %arg1: i32) -> (i32, i32) {
    %c0_i32 = arith.constant 0 : i32
    %c0_i32_0 = arith.constant 0 : i32
    return %arg0, %c0_i32 : i32, i32
  }
}

</mosaic_0001>

<bundles_post_ra>
// kernel: tpu_custom_call.1
= control target key start
LH: loop header
LB: loop body
LE: loop exit
PB: predicated region body
PF: predicated region fallthrough
CT: control target
= control target key end

     0   :  { %s1441_s0 = inlined_call_operand.hbm [shape: f32[16,32], index: 0, kind: input, shape index: {}]   ;;  %s1442_s1 = inlined_call_operand.hbm [shape: f32[16,16,32], index: 1, kind: input, shape index: {}]   ;;  %s1443_s2 = inlined_call_operand.hbm [shape: f32[32,32], index: 2, kind: input, shape index: {}]   ;;  %s1444_s3 = inlined_call_operand.hbm [shape: f32[16,16], index: 3, kind: output, shape index: {}]  }
   0x1   :  { %1456 = sst [smem:[#allocation21_spill]] %s1441_s0 }
   0x2   :  { %1457 = sst [smem:[#allocation22_spill]] %s1443_s2 }
   0x3   :  { %8 = vsyncpa [#allocation5], 0 }
   0x4   :  { %10 = vsyncpa [#allocation5 + $0x1], 0 }
   0x5   :  { %11 = vsyncpa [#allocation8], 0 }
   0x6   :  { %13 = vsyncpa [#allocation8 + $0x1], 0 }
   0x7   :  { %14 = vsyncpa [#allocation6], 0 }
   0x8   :  { %16 = vsyncpa [#allocation6 + $0x1], 0  ;;  %s1074_s12 = smov 0   ;;  %s1076_s13 = smov 0  }
   0x9   :  { %s1078_s14 = smov 0   ;;  %s1080_s15 = smov 0  }
   0xa   :  { %s1082_s16 = smov 0   ;;  %s1084_s17 = smov 0  }
   0xb   :  { %s1086_s18 = smov 0   ;;  %s1088_s19 = smov 0  }
   0xc   :  { %s1090_s20 = smov 0   ;;  %s1092_s21 = smov 0  }
   0xd   :  { %s1094_s22 = smov 0  }
   0xe LB: > { %1458 = sst [smem:[#allocation15_spill]] %s1021_s17  ;;  %s1128_s23 = sadd.s32 4294967295, %s1041_s22   ;;  %s1041_s22 = sphi %s1094_s22, %s22_s22   ;;  %s1037_s21 = sphi %s1092_s21, %s1501_s21   ;;  %s1033_s20 = sphi %s1090_s20, %s1500_s20   ;;  %s1029_s19 = sphi %s1088_s19, %s1499_s19   ;;  %s1025_s18 = sphi %s1086_s18, %s1498_s18   ;;  %s1021_s17 = sphi %s1084_s17, %s1490_s17   ;;  %s1017_s16 = sphi %s1082_s16, %s1497_s16   ;;  %s1013_s15 = sphi %s1080_s15, %s1496_s15   ;;  %s1009_s14 = sphi %s1078_s14, %s1495_s14   ;;  %s1005_s13 = sphi %s1076_s13, %s1494_s13   ;;  %s1001_s12 = sphi %s1074_s12, %s1493_s12  }
   0xf   : > { %p82_p0 = scmp.ne.s32.totalorder %s1005_s13, %s1001_s12  ;;  %p1445_p1 = scmp.eq.s32.totalorder %s1128_s23, 0 }
  0x10   : > { %p646_p2 = scmp.ge.s32.totalorder %s1041_s22, 1  ;;  %p140_p3 = scmp.lt.s32.totalorder %s1041_s22, 5 }
  0x11   : > { %p1136_p4 = por %p82_p0, %p1445_p1  ;;  %s1043_s26 = smov [#allocation9]  }
  0x12   : > { %p1140_p5 = pnand %p646_p2, %p140_p3  ;;  %s152_s27 = sshll.u32 %s1043_s26, 4  ;;  %s153_s27 = int_to_ptr.vmem [resolvable:$true] %s152_s27 }
  0x13   : > { %s1459_s24 = scalar_select %p1136_p4, 1, 0 }
  0x14   : > { %s1460_s25 = scalar_select %p1140_p5, 1, 0 }
  0x15   : > { %p701_p6 = pneg %p1140_p5  ;;  %s1462_s2 = sld [smem:[#allocation22_spill]] }
  0x17   : > { %p1148_p7 = pnand %p701_p6, %p1445_p1 }
  0x19   : > { %p825_p9 = pneg %p1148_p7 }
  0x1b   : > { %s823_s4 = scalar_lea.hbm %s1462_s2, 512 }
  0x1c   : > { %p824_p8 = scmp.ne.s32.totalorder %s1462_s2, %s823_s4  ;;  %p830_p12 = scmp.lt.u32.totalorder %s823_s4, %s1462_s2 }
  0x1e   : > { %p826_p10 = pnand %p825_p9, %p824_p8 }
  0x20   : > { %p827_p11 = pneg %p826_p10 }
  0x22   : > { %p832_p13 = pnand %p830_p12, %p827_p11 }
  0x24   : > { %835 = shalt.err (!%p832_p13)
}
  0x25   : > { %s836_s9 = scalar_lea.vmem %s153_s27, 512  ;;  %p844_p6 = scmp.lt.s32.totalorder %s153_s27, %s153_s27 }
  0x26   : > { %p837_p0 = scmp.ne.s32.totalorder %s153_s27, %s836_s9  ;;  %p845_p1 = scmp.lt.s32.totalorder %s836_s9, %s836_s9 }
  0x28   : > { %p839_p2 = pnand %p837_p0, %p825_p9  ;;  %p846_p4 = por %p845_p1, %p844_p6 }
  0x2a   : > { %p840_p3 = pneg %p839_p2 }
  0x2c   : > { %p847_p5 = pnand %p846_p4, %p840_p3 }
  0x2e   : > { %850 = shalt.err (!%p847_p5)
}
  0x2f   : > { %s1448_s10 = smov 128   ;;  %s1449_s11 = smov 8  }
  0x30   : > { %704 = dma.hbm_to_vmem [thread:$0]  (!%p1148_p7), %s1462_s2, 512, %s153_s27, [#allocation8], %s1448_s10, %s1448_s10, %s1449_s11  }
  0x31   : > { %s645_s29 = sadd.s32 4294967294, %s1041_s22   ;;  %s31_s30 = sadd.s32 1, %s1033_s20 }
  0x32   : > { %s34_s4 = sadd.s32 1, %s1037_s21  ;;  %p32_p1 = scmp.ge.s32.totalorder %s31_s30, 2 }
  0x33   : > { %s41_s5 = sadd.s32 1, %s1021_s17  ;;  %p48_p4 = scmp.ne.s32.totalorder %s1021_s17, %s1017_s16 }
  0x34   : > { %p49_p5 = scmp.eq.s32.totalorder %s1041_s22, 0  ;;  %s1503_s30 = smov (%p32_p1, %s31_s30), 0 }
  0x35   : > { %1463 = sst [smem:[#allocation16_spill]] %s1503_s30  ;;  %s1505_s4 = smov (!%p32_p1, %s34_s4), %s1037_s21 }
  0x36   : > { %p1186_p7 = por %p49_p5, %p48_p4  ;;  %p54_p8 = scmp.ne.s32.totalorder %s1017_s16, %s1013_s15 }
  0x37   : > { %p36_p9 = scmp.ge.s32.totalorder %s1505_s4, 2  ;;  %s64_s28 = ssub.s32 %s1033_s20, %s1503_s30 }
  0x38   : > { %p1465_p10 = scmp.eq.s32.totalorder %s1128_s23, 0  ;;  %s69_s7 = sadd.s32 1, %s1009_s14 }
  0x39   : > { %s1507_s4 = smov (%p36_p9, %s1505_s4), 0  ;;  %p76_p12 = scmp.ne.s32.totalorder %s1009_s14, %s1005_s13 }
  0x3a   : > { %p1199_p11 = por %p1465_p10, %p54_p8  ;;  %1467 = sst [smem:[#allocation17_spill]] %s1507_s4 }
  0x3b   : > { %p127_p13 = scmp.eq.s32.totalorder %s1128_s23, 3  ;;  %s38_s8 = ssub.s32 %s1037_s21, %s1507_s4 }
  0x3c   : > { %s1466_s6 = scalar_select %p1199_p11, 1, 0 }
  0x3d   : > { %p133_p0 = scmp.eq.s32.totalorder %s645_s29, 3  ;;  %p39_p2 = scmp.eq.s32.totalorder %s38_s8, 0 }
  0x3e   : > { %s66_s9 = sor.u32 %s64_s28, %s38_s8  ;;  %p1213_p6 = por %p76_p12, %p49_p5 }
  0x3f   : > { %p67_p3 = scmp.eq.s32.totalorder %s66_s9, 0  ;;  %p1226_p1 = por %p127_p13, %p48_p4 }
  0x40   : > { %s1218_s26 = scalar_select %p39_p2, %s1021_s17, %s41_s5  }
  0x41   : > { %s1221_s10 = scalar_select %p67_p3, %s1009_s14, %s69_s7  }
  0x42   : > { %1469 = sst [smem:[#allocation18_spill]] %s1218_s26  ;;  %p1233_p9 = por %p133_p0, %p54_p8 }
  0x43   : > { %1470 = sst [smem:[#allocation19_spill]] %s1221_s10  ;;  %p717_p10 = scmp.lt.s32.totalorder %s1041_s22, 4 }
  0x44   : > { %s1471_s11 = scalar_select %p1226_p1, 1, 0 }
  0x45   : > { %s1472_s29 = scalar_select %p1233_p9, 1, 0 }
  0x46   : > { %s166_s28 = sand.u32 1, %s1021_s17   ;;  %s650_s9 = sshll.u32 %s1037_s21, 7 }
  0x47   : > { %1473 = sst [smem:[#allocation20_spill]] %s1472_s29  ;;  %s649_s8 = sshll.u32 %s166_s28, 3 }
  0x48   : > { %s1474_s0 = sld [smem:[#allocation21_spill]]  ;;  %s170_s7 = scalar_lea.vmem [#allocation4], %s649_s8 }
  0x49   : > { %s177_s30 = sshll.u32 %s170_s7, 4  ;;  %p1249_p4 = pnand %p717_p10, %p1186_p7  ;;  %s1245_s30 = int_to_ptr.vmem [resolvable:$true] %s177_s30 }
  0x4a   : > { %p1255_p5 = pnand %p717_p10, %p1213_p6 }
  0x4b   : > { %p853_p12 = pneg %p1249_p4 }
  0x4e   : > { %s1243_s5 = scalar_lea.hbm %s1474_s0, %s650_s9  ;;  %s167_s9 = scalar_lea.sflag [#allocation5], %s166_s28 }
  0x4f   : > { %s851_s17 = scalar_lea.hbm %s1243_s5, 128  ;;  %s856_s12 = scalar_lea.hbm %s1474_s0, 256 }
  0x50   : > { %p852_p8 = scmp.ne.s32.totalorder %s1243_s5, %s851_s17  ;;  %p857_p0 = scmp.lt.u32.totalorder %s1243_s5, %s1474_s0 }
  0x51   : > { %p858_p2 = scmp.lt.u32.totalorder %s856_s12, %s851_s17  ;;  %p860_p6 = scmp.lt.u32.totalorder %s851_s17, %s1243_s5 }
  0x52   : > { %p854_p13 = pnand %p853_p12, %p852_p8 }
  0x53   : > { %p859_p3 = por %p858_p2, %p857_p0 }
  0x54   : > { %p855_p7 = pneg %p854_p13 }
  0x55   : > { %p861_p10 = por %p860_p6, %p859_p3 }
  0x57   : > { %p862_p9 = pnand %p861_p10, %p855_p7 }
  0x59   : > { %865 = shalt.err (!%p862_p9)
}
  0x5a   : > { %s866_s28 = scalar_lea.vmem %s1245_s30, 128  ;;  %s1046_s27 = smov [#allocation4]  }
  0x5b   : > { %p867_p8 = scmp.ne.s32.totalorder %s1245_s30, %s866_s28  ;;  %s871_s8 = sshll.u32 %s1046_s27, 4  ;;  %s872_s8 = int_to_ptr.vmem [resolvable:$false] %s871_s8 }
  0x5c   : > { %s873_s10 = scalar_lea.vmem %s872_s8, 256  ;;  %p874_p11 = scmp.lt.s32.totalorder %s1245_s30, %s872_s8 }
  0x5d   : > { %p869_p13 = pnand %p867_p8, %p853_p12  ;;  %p875_p0 = scmp.lt.s32.totalorder %s873_s10, %s866_s28 }
  0x5f   : > { %p870_p1 = pneg %p869_p13  ;;  %p876_p2 = por %p875_p0, %p874_p11 }
  0x61   : > { %p877_p3 = pnand %p876_p2, %p870_p1 }
  0x63   : > { %880 = shalt.err (!%p877_p3)
}
  0x64   : > { %708 = dma.hbm_to_vmem [thread:$0]  (!%p1249_p4), %s1243_s5, 128, %s1245_s30, %s167_s9  }
  0x65   : > { %s186_s17 = sand.u32 1, %s1009_s14   ;;  %s668_s7 = sshll.u32 %s1033_s20, 4 }
  0x66   : > { %s651_s12 = sshll.u32 %s186_s17, 6  ;;  %s194_s27 = sadd.s32 %s1037_s21, %s668_s7 }
  0x67   : > { %s654_s8 = sshll.u32 %s194_s27, 7  ;;  %s188_s28 = scalar_lea.vmem [#allocation7], %s651_s12 }
  0x68   : > { %s197_s10 = sshll.u32 %s188_s28, 4  ;;  %s1291_s26 = scalar_lea.hbm %s1442_s1, %s654_s8  ;;  %s1293_s10 = int_to_ptr.vmem [resolvable:$true] %s197_s10 }
  0x69   : > { %s1477_s29 = sand.u32 1, %s1041_s22   ;;  %s881_s5 = scalar_lea.hbm %s1291_s26, 1024 }
  0x6a   : > { %s1297_s30 = scalar_lea.sflag [#allocation8], %s1477_s29  ;;  %p882_p11 = scmp.ne.s32.totalorder %s1291_s26, %s881_s5 }
  0x6b   : > { %p883_p1 = pneg %p1255_p5  ;;  %s886_s9 = scalar_lea.hbm %s1442_s1, 4096 }
  0x6c   : > { %p887_p12 = scmp.lt.u32.totalorder %s1291_s26, %s1442_s1  ;;  %p888_p7 = scmp.lt.u32.totalorder %s886_s9, %s881_s5 }
  0x6d   : > { %p884_p9 = pnand %p883_p1, %p882_p11  ;;  %p890_p10 = scmp.lt.u32.totalorder %s881_s5, %s1291_s26 }
  0x6e   : > { %p889_p6 = por %p888_p7, %p887_p12 }
  0x6f   : > { %p885_p4 = pneg %p884_p9 }
  0x70   : > { %p891_p8 = por %p890_p10, %p889_p6 }
  0x72   : > { %p892_p13 = pnand %p891_p8, %p885_p4 }
  0x74   : > { %895 = shalt.err (!%p892_p13)
}
  0x75   : > { %s896_s29 = scalar_lea.vmem %s1293_s10, 1024  ;;  %s1047_s7 = smov [#allocation7]  }
  0x76   : > { %p897_p0 = scmp.ne.s32.totalorder %s1293_s10, %s896_s29  ;;  %s901_s27 = sshll.u32 %s1047_s7, 4  ;;  %s902_s27 = int_to_ptr.vmem [resolvable:$false] %s901_s27 }
  0x77   : > { %s903_s8 = scalar_lea.vmem %s902_s27, 2048  ;;  %p904_p11 = scmp.lt.s32.totalorder %s1293_s10, %s902_s27 }
  0x78   : > { %p899_p2 = pnand %p897_p0, %p883_p1  ;;  %p905_p9 = scmp.lt.s32.totalorder %s903_s8, %s896_s29 }
  0x7a   : > { %p900_p3 = pneg %p899_p2  ;;  %p906_p12 = por %p905_p9, %p904_p11 }
  0x7c   : > { %p907_p7 = pnand %p906_p12, %p900_p3 }
  0x7e   : > { %910 = shalt.err (!%p907_p7)
}
  0x7f   : > { %s1048_s28 = smov 256   ;;  %s1478_s5 = smov 8  }
  0x80   : > { %s1479_s0 = smov 128   ;;  %p1480_p1 = scmp.ne.s32.totalorder %s1460_s25, 0 }
  0x81   : > { %711 = dma.hbm_to_vmem [thread:$0]  (!%p1255_p5), %s1291_s26, 1024, %s1293_s10, %s1297_s30, %s1048_s28, %s1479_s0, %s1478_s5  }
  0x82   : > { %209 = sbr.rel (%p1480_p1) target bundleno = 1142 (0x476), region = 32  ;;  %s1330_s4 = sand.u32 (!%p1480_p1), 1, %s1017_s16  }
  0x83   : > { %s656_s9 = sshll.u32 (!%p1480_p1), %s1330_s4, 3  ;;  %s212_s17 = scalar_lea.sflag (!%p1480_p1), [#allocation5], %s1330_s4 }
  0x84   : > { %s215_s12 = scalar_lea.vmem (!%p1480_p1), [#allocation4], %s656_s9  ;;  %p1481_p4 = scmp.ne.s32.totalorder (!%p1480_p1), %s1466_s6, 0 }
  0x89   : > { %984 = dma.done.wait (%p1481_p4), %s212_s17, 128  }
  0x8a   : > { %986 = vsyncadd (%p1481_p4), %s212_s17, 4294967168  ;;  %s220_s2 = sand.u32 1, %s1128_s23   ;;  %s222_s25 = sand.u32 1, %s1005_s13  }
  0x8b   : > { %s657_s10 = sshll.u32 %s222_s25, 6  ;;  %s221_s26 = scalar_lea.sflag [#allocation8], %s220_s2 }
  0x8c   : > { %s1340_s30 = scalar_lea.vmem [#allocation7], %s657_s10  ;;  %p1482_p5 = scmp.ne.s32.totalorder %s1459_s24, 0 }
  0x8e   : > { %988 = dma.done.wait (%p1482_p5), %s221_s26, 1024  }
  0x8f   : > { %990 = vsyncadd (%p1482_p5), %s221_s26, 4294966272  ;;  %p1483_p6 = scmp.eq.s32.totalorder %s1128_s23, 0 }
  0x91   : > { %992 = dma.done.wait (%p1483_p6), [#allocation8], 512   ;;  %p1484_p10 = pmov %p1483_p6 }
  0x92   : > { %s1350_s6 = scalar_lea.vmem [#allocation10], %s656_s9  ;;  %p660_p8 = scmp.ne.s32.totalorder %s1025_s18, 0 }
  0x93   : > { %994 = vsyncadd (%p1484_p10), [#allocation8], 4294966784  ;;  %v262_v0 = vld [vmem:[#allocation9] sm:$0xff] (!%p660_p8)  ;;  %v263_v1 = vld [vmem:[#allocation9 + $0x8] sm:$0xff] (!%p660_p8)  ;;  %v1049_v3 = vmov (!%p660_p8), 0.0|0.0   ;;  %vm1050_vm0 = vmmov (!%p660_p8), 0  }
  0x94   : > { %260 = sbr.rel (%p660_p8) target bundleno = 370 (0x172), region = 48  ;;  %v264_v2 = vld [vmem:[#allocation9 + $0x10] sm:$0xff] (!%p660_p8)  ;;  %685 = vmatprep.subr.bf16.mxu0 (!%p660_p8), %v1049_v3  ;;  %v686_v4 = vpack.c.bf16 (!%p660_p8), %v263_v1, %v262_v0  ;;  %v265_v5 = vld [vmem:[#allocation9 + $0x18] sm:$0xff] (!%p660_p8)  ;;  %v1051_v6 = vmov (!%p660_p8), 0.0   ;;  %vm266_vm1 = vcmask (!%p660_p8), 261120  }
  0x95   : > { %682 = vmatprep.mubr.msk.f32.mxu0 (!%p660_p8), %vm1050_vm0, %v1051_v6  ;;  %v689_v7 = vpack.c.bf16 (!%p660_p8), %v265_v5, %v264_v2  ;;  %v261_v8 = vld [vmem:[%s215_s12] sm:$0xff] (!%p660_p8) }
  0x96   : > { %687 = vmatpush3.bf16.msra.mxu0 (!%p660_p8), %v686_v4 }
  0x97   : > { %688 = vmatprep.subr.bf16.mxu0 (!%p660_p8), %v1049_v3 }
  0x9a   : > { %690 = vmatpush3.bf16.msra.mxu0 (!%p660_p8), %v689_v7 }
  0x9d   : > { %683 = vmatmul.mubr.msk.f32.vlgmr.msra.gmra.mrb[0].mxu0 %vm266_vm1, %v261_v8 }
 0x170   : > { %v336_v9 = vpop.f32.mrb[0].mxu0 }
 0x171   : > { %340 = vst.msk [vmem:[#allocation2] sm:$0xff] %vm266_vm1, %v336_v9  ;;  %v684_v10 = vpop.f32.mrb[1].mxu0 }
 0x172 PF: > { %v341_v11 = vld [vmem:[%s1340_s30] sm:$0xff]  ;;  %vm358_vm2 = vcmask 261120   ;;  %v343_v13 = vld [vmem:[%s1340_s30 + $0x10] sm:$0xff]  ;;  %v342_v16 = vld [vmem:[%s1340_s30 + $0x8] sm:$0xff]  ;;  %v391_v36 = vlaneseq  ;;  %vm425_vm3 = vcmask 1041409   ;;  %vm427_vm4 = vcmask 1042434  }
 0x173   : > { %v344_v17 = vld [vmem:[%s1340_s30 + $0x18] sm:$0xff]  ;;  %v345_v20 = vld [vmem:[%s1340_s30 + $0x20] sm:$0xff]  ;;  %v346_v21 = vld [vmem:[%s1340_s30 + $0x28] sm:$0xff]  ;;  %vm429_vm5 = vcmask 1043459   ;;  %vm431_vm6 = vcmask 1044484   ;;  %vm433_vm7 = vcmask 1045509  }
 0x174   : > { %v347_v28 = vld [vmem:[%s1340_s30 + $0x30] sm:$0xff]  ;;  %v348_v29 = vld [vmem:[%s1340_s30 + $0x38] sm:$0xff]  ;;  %v392_v37 = vand.u32 127, %v391_v36  ;;  %v394_v38 = vshrl.u32 %v391_v36, 7  ;;  %vm435_vm8 = vcmask 1046534   ;;  %vm437_vm9 = vcmask 1047559  }
 0x175   : > { %s662_s23 = sshll.u32 %s1025_s18, 3  ;;  %vm474_vm10 = vcmask 64512   ;;  %p663_p13 = scmp.ne.s32.totalorder %s1025_s18, 1 }
 0x176   : > { %v395_v41 = vsub.s32 %v392_v37, %v394_v38  ;;  %s473_s24 = scalar_lea.vmem [#allocation3], %s662_s23  ;;  %s1052_s18 = smov (!%p663_p13), 8   ;;  %vm511_vm11 = vcmask (!%p663_p13), 130112  }
 0x178   : > { %v349_v12 = vld [vmem:[#allocation2] sm:$0xff] }
 0x179   : > { %v350_v14 = vmul.f32 %v349_v12, %v341_v11  ;;  %v352_v15 = vmul.f32 %v349_v12, %v343_v13  ;;  %v351_v18 = vmul.f32 %v349_v12, %v342_v16  ;;  %v353_v19 = vmul.f32 %v349_v12, %v344_v17 }
 0x17a   : > { %v354_v26 = vmul.f32 %v349_v12, %v345_v20  ;;  %v355_v27 = vmul.f32 %v349_v12, %v346_v21  ;;  %v356_v32 = vmul.f32 %v349_v12, %v347_v28  ;;  %v357_v33 = vmul.f32 %v349_v12, %v348_v29 }
 0x17b   : > { %v359_v22 = vsel %vm358_vm2, %v350_v14, 0.0  ;;  %v365_v23 = vsel %vm358_vm2, %v352_v15, 0.0  ;;  %v362_v24 = vsel %vm358_vm2, %v351_v18, 0.0  ;;  %v368_v25 = vsel %vm358_vm2, %v353_v19, 0.0 }
 0x17c   : > { %360 = vadd.xlane.f32.xlu0 %v359_v22  ;;  %366 = vadd.xlane.f32.xlu1 %v365_v23  ;;  %v371_v30 = vsel %vm358_vm2, %v354_v26, 0.0  ;;  %v374_v31 = vsel %vm358_vm2, %v355_v27, 0.0  ;;  %v377_v34 = vsel %vm358_vm2, %v356_v32, 0.0  ;;  %v380_v35 = vsel %vm358_vm2, %v357_v33, 0.0 }
 0x180   : > { %363 = vadd.xlane.f32.xlu0 %v362_v24  ;;  %369 = vadd.xlane.f32.xlu1 %v368_v25 }
 0x184   : > { %372 = vadd.xlane.f32.xlu0 %v371_v30  ;;  %375 = vadd.xlane.f32.xlu1 %v374_v31 }
 0x188   : > { %378 = vadd.xlane.f32.xlu0 %v377_v34  ;;  %381 = vadd.xlane.f32.xlu1 %v380_v35 }
 0x209   : > { %v361_v39 = vpop.xlane.xlu0 %360  ;;  %v367_v40 = vpop.xlane.xlu1 %366 }
 0x20a   : > { %v396_v44 = vrot.slane %v361_v39, %v395_v41  ;;  %v404_v47 = vrot.slane %v367_v40, %v395_v41 }
 0x20d   : > { %v364_v42 = vpop.xlane.xlu0 %363  ;;  %v370_v43 = vpop.xlane.xlu1 %369 }
 0x20e   : > { %v400_v45 = vrot.slane %v364_v42, %v395_v41  ;;  %v408_v46 = vrot.slane %v370_v43, %v395_v41 }
 0x210   : > { %v426_v48 = vsel %vm425_vm3, %v400_v45, %v396_v44 }
 0x211   : > { %v428_v49 = vsel %vm427_vm4, %v404_v47, %v426_v48  ;;  %v373_v50 = vpop.xlane.xlu0 %372  ;;  %v376_v51 = vpop.xlane.xlu1 %375 }
 0x212   : > { %v430_v52 = vsel %vm429_vm5, %v408_v46, %v428_v49  ;;  %v412_v53 = vrot.slane %v373_v50, %v395_v41  ;;  %v416_v54 = vrot.slane %v376_v51, %v395_v41 }
 0x214   : > { %v432_v55 = vsel %vm431_vm6, %v412_v53, %v430_v52 }
 0x215   : > { %v379_v56 = vpop.xlane.xlu0 %378  ;;  %v382_v57 = vpop.xlane.xlu1 %381  ;;  %v434_v60 = vsel %vm433_vm7, %v416_v54, %v432_v55 }
 0x216   : > { %v420_v58 = vrot.slane %v379_v56, %v395_v41  ;;  %v424_v59 = vrot.slane %v382_v57, %v395_v41 }
 0x218   : > { %v436_v61 = vsel %vm435_vm8, %v420_v58, %v434_v60 }
 0x219   : > { %v438_v62 = vsel %vm437_vm9, %v424_v59, %v436_v61 }
 0x21a   : > { %440 = vxpose.xlu0.b32.start.end [1/1] (short) (narrow) %v438_v62, 8 }
 0x295   : > { %479 = sbr.rel (%p663_p13) target bundleno = 1117 (0x45d), region = 52 }
 0x29a   : > { %v456_v63 = vpop.trf.xlu0 }
 0x29b   : > { %475 = vst.msk [vmem:[%s473_s24] sm:$0xff] %vm474_vm10, %v456_v63 }
 0x2a2   : > { %v480_v0 = vld [vmem:[#allocation3] sm:$0xff]  ;;  %v481_v1 = vld [vmem:[#allocation3 + $0x8] sm:$0xff] }
 0x2a3   : > { %v482_v2 = vsel %vm474_vm10, %v480_v0, -inf  ;;  %v485_v3 = vsel %vm474_vm10, %v481_v1, -inf }
 0x2a4   : > { %483 = vmax.xlane.f32.xlu0 %v482_v2 }
 0x2a8   : > { %486 = vmax.xlane.f32.xlu0 %v485_v3 }
 0x331   : > { %v484_v4 = vpop.xlane.xlu0 %483 }
 0x335   : > { %v487_v5 = vpop.xlane.xlu0 %486 }
 0x336   : > { %v488_v6 = vmax.f32 %v484_v4, %v487_v5 }
 0x338   : > { %v489_v7 = vsub.f32 %v480_v0, %v488_v6  ;;  %v490_v8 = vsub.f32 %v481_v1, %v488_v6 }
 0x33a   : > { %v491_v9 = vmul.f32 1.442695, %v489_v7  ;;  %v493_v10 = vmul.f32 1.442695, %v490_v8 }
 0x33c   : > { %817 = vpow2.f32 %v491_v9 }
 0x33d   : > { %819 = vpow2.f32 %v493_v10 }
 0x346   : > { %v818_v11 = vpop.eup %817 }
 0x347   : > { %v495_v12 = vsel %vm474_vm10, %v818_v11, 0.0  ;;  %v820_v13 = vpop.eup %819 }
 0x348   : > { %496 = vadd.xlane.f32.xlu1 %v495_v12  ;;  %v498_v14 = vsel %vm474_vm10, %v820_v13, 0.0 }
 0x34c   : > { %499 = vadd.xlane.f32.xlu1 %v498_v14 }
 0x3d5   : > { %v497_v15 = vpop.xlane.xlu1 %496 }
 0x3d9   : > { %v500_v16 = vpop.xlane.xlu1 %499 }
 0x3da   : > { %v501_v17 = vadd.f32 %v500_v16, %v497_v15 }
 0x3dc   : > { %821 = vrcp.f32 %v501_v17 }
 0x3e6   : > { %v822_v18 = vpop.eup %821 }
 0x3e7   : > { %v505_v19 = vmul.f32 %v822_v18, %v820_v13  ;;  %v504_v20 = vmul.f32 %v822_v18, %v818_v11 }
 0x3e9   : > { %508 = vrot.lane.b32.xlu0 %v505_v19, %s1052_s18  ;;  %506 = vst.msk [vmem:[%s1350_s6] sm:$0xff] %vm474_vm10, %v504_v20 }
 0x45b   : > { %v509_v21 = vpop.permute.xlu0 %508 }
 0x45c   : > { %512 = vst.msk [vmem:[%s1350_s6] sm:$0xff] %vm511_vm11, %v509_v21 }
 0x45d PF: > { %s665_s29 = sshll.u32 %s1029_s19, 7  ;;  %s527_s28 = sshll.u32 %s1350_s6, 4  ;;  %s528_s28 = int_to_ptr.vmem [resolvable:$true] %s527_s28 }
 0x45e   : > { %s1383_s8 = scalar_lea.hbm %s1444_s3, %s665_s29  ;;  %s514_s5 = scalar_lea.sflag [#allocation6], %s1330_s4 }
 0x45f   : > { %s911_s0 = scalar_lea.vmem %s528_s28, 128  ;;  %p1485_p2 = scmp.ne.s32.totalorder %s1471_s11, 0 }
 0x460   : > { %p912_p0 = scmp.ne.s32.totalorder %s528_s28, %s911_s0  ;;  %s1053_s9 = smov [#allocation10]  }
 0x461   : > { %s915_s17 = sshll.u32 %s1053_s9, 4  ;;  %s916_s17 = int_to_ptr.vmem [resolvable:$false] %s915_s17 }
 0x462   : > { %p913_p3 = pnand %p912_p0, %p1485_p2  ;;  %s917_s12 = scalar_lea.vmem %s916_s17, 256 }
 0x463   : > { %p918_p9 = scmp.lt.s32.totalorder %s528_s28, %s916_s17  ;;  %p919_p12 = scmp.lt.s32.totalorder %s917_s12, %s911_s0 }
 0x464   : > { %p914_p11 = pneg %p913_p3 }
 0x465   : > { %p920_p7 = por %p919_p12, %p918_p9 }
 0x467   : > { %p921_p1 = pnand %p920_p7, %p914_p11 }
 0x469   : > { %924 = shalt.err (!%p921_p1)
}
 0x46a   : > { %s925_s19 = scalar_lea.hbm %s1383_s8, 128  ;;  %s929_s25 = scalar_lea.hbm %s1444_s3, 256 }
 0x46b   : > { %p926_p4 = scmp.ne.s32.totalorder %s1383_s8, %s925_s19  ;;  %p930_p10 = scmp.lt.u32.totalorder %s1383_s8, %s1444_s3 }
 0x46c   : > { %p931_p8 = scmp.lt.u32.totalorder %s929_s25, %s925_s19  ;;  %p933_p0 = scmp.lt.u32.totalorder %s925_s19, %s1383_s8 }
 0x46d   : > { %p927_p5 = pnand %p926_p4, %p1485_p2 }
 0x46e   : > { %p932_p13 = por %p931_p8, %p930_p10 }
 0x46f   : > { %p928_p6 = pneg %p927_p5 }
 0x470   : > { %p934_p3 = por %p933_p0, %p932_p13 }
 0x472   : > { %p935_p11 = pnand %p934_p3, %p928_p6 }
 0x474   : > { %938 = shalt.err (!%p935_p11)
}
 0x475   : > { %699 = dma.vmem_to_hbm [thread:$0]  (%p1485_p2), %s528_s28, 128, %s1383_s8, %s514_s5  }
 0x476 PF: > { %s1486_s30 = sld [smem:[#allocation20_spill]]  ;;  %p719_p9 = scmp.ge.s32.totalorder %s1041_s22, 2 }
 0x477   : > { %s539_s6 = sand.u32 1, %s1013_s15  }
 0x478   : > { %s540_s23 = scalar_lea.sflag [#allocation6], %s539_s6 }
 0x47c   : > { %p1487_p12 = scmp.ne.s32.totalorder %s1486_s30, 0 }
 0x47e   : > { %p713_p7 = pnand %p719_p9, %p1487_p12 }
 0x480   : > { %996 = dma.done.wait (!%p713_p7), %s540_s23, 128  }
 0x481   : > { %998 = vsyncadd (!%p713_p7), %s540_s23, 4294967168  ;;  %s22_s22 = sadd.s32 1, %s1041_s22   ;;  %s1488_s24 = sld [smem:[#allocation19_spill]] }
 0x482   : > { %p19_p1 = scmp.ge.s32.totalorder %s22_s22, 6   ;;  %s1489_s11 = sld [smem:[#allocation15_spill]] }
 0x483   : > { %s1490_s17 = sld [smem:[#allocation18_spill]]  ;;  %s1491_s29 = sld [smem:[#allocation16_spill]] }
 0x484   : > { %s1492_s7 = sld [smem:[#allocation17_spill]]  ;;  %s1493_s12 = smov %s1005_s13 }
 0x485   : > { %s1494_s13 = smov %s1009_s14  ;;  %s1496_s15 = smov %s1017_s16 }
 0x486   : > { %s1498_s18 = smov %s1033_s20  ;;  %s1499_s19 = smov %s1037_s21 }
 0x487   : > { %s1495_s14 = smov %s1488_s24  ;;  %21 = sbr.rel (!%p19_p1) target bundleno = 14 (0xe), region = 103 }
 0x488   : > { %s1497_s16 = smov %s1489_s11 }
 0x489   : > { %s1500_s20 = smov %s1491_s29 }
 0x48a   : > { %s1501_s21 = smov %s1492_s7 }
 0x48e   :  { %545 = vsyncpa [#allocation5], 1 }
 0x48f   :  { %547 = vsyncpa [#allocation5 + $0x1], 1 }
 0x490   :  { %548 = vsyncpa [#allocation8], 1 }
 0x491   :  { %550 = vsyncpa [#allocation8 + $0x1], 1 }
 0x492   :  { %551 = vsyncpa [#allocation6], 1 }
 0x493   :  { %553 = vsyncpa [#allocation6 + $0x1], 1 }

</bundles_post_ra>
